<compile_context>
chip_gen: v7x
topology: tpu7x:2x2x1
jax: 0.10.0
libtpu: 0.0.40
codegen_flags: <defaults>
</compile_context>

<pallas_src>
import jax
import jax.numpy as jnp
from jax.experimental import pallas as pl
from jax.experimental.pallas import tpu as pltpu


def _round_up(x, m):
    return ((x + m - 1) // m) * m


def _default_pack():
    """Logical rows packed per physical row.

    4 fully fills v5e's 128-wide MXU contraction (K = 4*32 = 128);
    8 fills the 256-wide MXU on v6e / v7x.
    """
    try:
        kind = jax.devices()[0].device_kind.lower()
    except Exception:
        return 4
    for old in ("v2", "v3", "v4", "v5"):
        if old in kind:
            return 4
    return 8


def _mlp_kernel(x_ref, w1_ref, w2_ref, w3_ref, o_ref):
    # In-kernel bf16 cast: x is read from HBM exactly once (f32); the VPU cast
    # is free under the MXU bottleneck and removes a separate XLA cast pass.
    x = x_ref[...].astype(jnp.bfloat16)
    # Layer 1: Linear(iSize -> f0, bias=False) + ReLU   (block-diag packed)
    h = jnp.dot(x, w1_ref[...], preferred_element_type=jnp.float32)
    h = jnp.maximum(h, 0.0)                       # ReLU in f32 (safe on v5e VPU)
    # Layer 2: Linear(f0 -> f1, bias=False) + ReLU
    h = jnp.dot(h.astype(jnp.bfloat16), w2_ref[...],
                preferred_element_type=jnp.float32)
    h = jnp.maximum(h, 0.0)
    # Layer 3: Linear(f1 -> f2, bias=False), activation 'linear' (identity)
    o_ref[...] = jnp.dot(
        h.astype(jnp.bfloat16), w3_ref[...], preferred_element_type=jnp.float32
    ).astype(o_ref.dtype)


def mlp_forward(x, weights, *, tile_rows=8192, pack=None):
    """Forward pass of the MLP.

    x:        [N, iSize] float32
    weights:  list of PyTorch-layout (out, in) float32 matrices
    returns:  [N, fSize[-1]] float32
    """
    n, i_size = x.shape
    out_dim = weights[-1].shape[0]
    if pack is None:
        pack = _default_pack()

    # ---- one-time weight prep (wrapper, not per grid step) ------------------
    # PyTorch (out, in) -> (in, out), bf16, then block-diagonal x pack so that
    # `pack` logical batch rows ride in one lane-dense physical row.
    eye = jnp.eye(pack, dtype=jnp.bfloat16)
    w1p, w2p, w3p = (jnp.kron(eye, w.T.astype(jnp.bfloat16)) for w in weights)

    # ---- pack the batch: (N, iSize) f32 -> (N/pack, pack*iSize) f32 ----------
    n_pk = _round_up(n, pack)
    if n_pk != n:                              # tiny pad only when N % pack != 0
        x = jnp.pad(x, ((0, n_pk - n), (0, 0)))
    rows = n_pk // pack
    xp = x.reshape(rows, pack * i_size)        # contiguous -> free reshape, stays f32

    # ---- batch tiling (packed rows) ------------------------------------------
    granule = 16                               # bf16 sublane packing: 16 rows / vreg
    tn = min(_round_up(max(1, tile_rows // pack), granule),
             _round_up(rows, granule))
    grid_n = pl.cdiv(rows, tn)
    # Best-effort: keep the grid even (>=2) so both v7x TensorCores get work.
    if grid_n > 1 and grid_n % 2 == 1:
        tn = max(granule, _round_up(pl.cdiv(rows, grid_n + 1), granule))
        grid_n = pl.cdiv(rows, tn)

    in_w, out_w = pack * i_size, pack * out_dim
    hid_widths = [w.shape[0] for w in weights[:-1]]

    # Explicit scoped-VMEM budget: double-buffered (in + out) tiles + resident
    # weights + f32/bf16 hidden activations + slack. Well under every chip's
    # physical VMEM at the default tile (~15 MiB).
    vmem_limit = int(
        2 * tn * (in_w + out_w) * 4
        + sum(int(w.size) * 2 for w in (w1p, w2p, w3p))
        + sum(tn * pack * hw * 6 for hw in hid_widths)
        + (4 << 20)
    )

    def weight_spec(w):
        # Weights stay VMEM-resident across all grid steps.
        return pl.BlockSpec(w.shape, lambda i: (0, 0))

    out = pl.pallas_call(
        _mlp_kernel,
        out_shape=jax.ShapeDtypeStruct((rows, out_w), jnp.float32),
        grid=(grid_n,),
        in_specs=[
            pl.BlockSpec((tn, in_w), lambda i: (i, 0)),
            weight_spec(w1p),
            weight_spec(w2p),
            weight_spec(w3p),
        ],
        out_specs=pl.BlockSpec((tn, out_w), lambda i: (i, 0)),
        compiler_params=pltpu.CompilerParams(
            dimension_semantics=("parallel",),   # megacore sharding on v7x
            vmem_limit_bytes=vmem_limit,
        ),
    )(xp, w1p, w2p, w3p)

    # Unpack: (rows, pack*out) -> (n_pk, out) is the exact inverse reshape.
    out = out.reshape(n_pk, out_dim)
    if n_pk != n:
        out = out[:n]
    return out


def init_params(key, i_size, f_sizes):
    """Deterministic init mimicking nn.Linear default (uniform +/- 1/sqrt(fan_in))."""
    params = []
    in_dim = i_size
    for out_dim in f_sizes:
        key, sub = jax.random.split(key)
        bound = 1.0 / jnp.sqrt(in_dim)
        w = jax.random.uniform(sub, (out_dim, in_dim), jnp.float32, -bound, bound)
        params.append(w)
        in_dim = out_dim
    return params


if __name__ == "__main__":
    i_size = 32
    f_sizes = [64, 64, 32]
    batch = 200            # not a multiple of pack or tile -> exercises padding,
                           # ragged last block, and a 2-step grid

    key = jax.random.PRNGKey(0)
    key, kx = jax.random.split(key)
    x = jax.random.normal(kx, (batch, i_size), jnp.float32)
    weights = init_params(key, i_size, f_sizes)

    # Small tile_rows so the small demo batch still runs a multi-step grid.
    y = mlp_forward(x, weights, tile_rows=128)
    y = jax.block_until_ready(y)
    assert y.shape == (batch, f_sizes[-1])

    # Reference in plain JAX f32 (same semantics as the PyTorch forward).
    # Tolerances loosened for bf16 matmul inputs (f32 accumulation keeps error
    # bounded by input rounding, ~2^-8 relative).
    ref = x
    for i, w in enumerate(weights):
        ref = ref @ w.T
        if i < len(weights) - 1:   # act = 'relu', 'relu', 'linear'
            ref = jnp.maximum(ref, 0.0)
    assert jnp.allclose(y, ref, atol=2e-2, rtol=2e-2), (
        float(jnp.max(jnp.abs(y - ref)))
    )

    print("KERNEL_OK")
</pallas_src>

<mosaic_0001>
module attributes {stable_mosaic.version = 11 : i64} {
  func.func @_mlp_kernel(%arg0: i32, %arg1: memref<16x256xf32, #tpu.memory_space<vmem>>, %arg2: memref<256x512xbf16, #tpu.memory_space<vmem>>, %arg3: memref<512x512xbf16, #tpu.memory_space<vmem>>, %arg4: memref<512x256xbf16, #tpu.memory_space<vmem>>, %arg5: memref<16x256xf32, #tpu.memory_space<vmem>>) attributes {dimension_semantics = [#tpu.dimension_semantics<parallel>], iteration_bounds = array<i64: 2>, scalar_prefetch = 0 : i64, scratch_operands = 0 : i64, tpu.core_type = #tpu.core_type<tc>, window_params = [{transform_indices = @transform_0, window_bounds = array<i64: 16, 256>}, {pipeline_mode = #tpu.pipeline_mode<synchronous>, transform_indices = @transform_1, window_bounds = array<i64: 256, 512>}, {pipeline_mode = #tpu.pipeline_mode<synchronous>, transform_indices = @transform_2, window_bounds = array<i64: 512, 512>}, {pipeline_mode = #tpu.pipeline_mode<synchronous>, transform_indices = @transform_3, window_bounds = array<i64: 512, 256>}, {transform_indices = @transform_4, window_bounds = array<i64: 16, 256>}]} {
    %c0 = arith.constant 0 : index
    %c0_0 = arith.constant 0 : index
    %0 = vector.load %arg1[%c0, %c0_0] : memref<16x256xf32, #tpu.memory_space<vmem>>, vector<16x256xf32>
    %1 = arith.truncf %0 : vector<16x256xf32> to vector<16x256xbf16>
    %c0_1 = arith.constant 0 : index
    %c0_2 = arith.constant 0 : index
    %2 = vector.load %arg2[%c0_1, %c0_2] : memref<256x512xbf16, #tpu.memory_space<vmem>>, vector<256x512xbf16>
    %cst = arith.constant dense<0.000000e+00> : vector<16x512xf32>
    %3 = tpu.matmul %1, %2, %cst {dimension_numbers = #tpu.dot_dimension_numbers<[1], [0], [0], [1], [0, 0, 1, 1], [], []>} : vector<16x256xbf16>, vector<256x512xbf16>, vector<16x512xf32> -> vector<16x512xf32>
    %cst_3 = arith.constant 0.000000e+00 : f32
    %4 = vector.broadcast %cst_3 : f32 to vector<16x512xf32>
    %5 = arith.maximumf %3, %4 : vector<16x512xf32>
    %6 = arith.truncf %5 : vector<16x512xf32> to vector<16x512xbf16>
    %c0_4 = arith.constant 0 : index
    %c0_5 = arith.constant 0 : index
    %7 = vector.load %arg3[%c0_4, %c0_5] : memref<512x512xbf16, #tpu.memory_space<vmem>>, vector<512x512xbf16>
    %cst_6 = arith.constant dense<0.000000e+00> : vector<16x512xf32>
    %8 = tpu.matmul %6, %7, %cst_6 {dimension_numbers = #tpu.dot_dimension_numbers<[1], [0], [0], [1], [0, 0, 1, 1], [], []>} : vector<16x512xbf16>, vector<512x512xbf16>, vector<16x512xf32> -> vector<16x512xf32>
    %cst_7 = arith.constant 0.000000e+00 : f32
    %9 = vector.broadcast %cst_7 : f32 to vector<16x512xf32>
    %10 = arith.maximumf %8, %9 : vector<16x512xf32>
    %11 = arith.truncf %10 : vector<16x512xf32> to vector<16x512xbf16>
    %c0_8 = arith.constant 0 : index
    %c0_9 = arith.constant 0 : index
    %12 = vector.load %arg4[%c0_8, %c0_9] : memref<512x256xbf16, #tpu.memory_space<vmem>>, vector<512x256xbf16>
    %cst_10 = arith.constant dense<0.000000e+00> : vector<16x256xf32>
    %13 = tpu.matmul %11, %12, %cst_10 {dimension_numbers = #tpu.dot_dimension_numbers<[1], [0], [0], [1], [0, 0, 1, 1], [], []>} : vector<16x512xbf16>, vector<512x256xbf16>, vector<16x256xf32> -> vector<16x256xf32>
    %c0_11 = arith.constant 0 : index
    %c0_12 = arith.constant 0 : index
    %14 = vector.load %arg5[%c0_11, %c0_12] : memref<16x256xf32, #tpu.memory_space<vmem>>, vector<16x256xf32>
    tpu.vector_store %arg5[%c0_11, %c0_12], %13 {strides = array<i32>} : memref<16x256xf32, #tpu.memory_space<vmem>>, vector<16x256xf32>,
    return
  }
  func.func @transform_0(%arg0: i32) -> (i32, i32) {
    %c0_i32 = arith.constant 0 : i32
    %c0_i32_0 = arith.constant 0 : i32
    return %arg0, %c0_i32 : i32, i32
  }
  func.func @transform_1(%arg0: i32) -> (i32, i32) {
    %c0_i32 = arith.constant 0 : i32
    %c0_i32_0 = arith.constant 0 : i32
    %c0_i32_1 = arith.constant 0 : i32
    return %c0_i32, %c0_i32_0 : i32, i32
  }
  func.func @transform_2(%arg0: i32) -> (i32, i32) {
    %c0_i32 = arith.constant 0 : i32
    %c0_i32_0 = arith.constant 0 : i32
    %c0_i32_1 = arith.constant 0 : i32
    return %c0_i32, %c0_i32_0 : i32, i32
  }
  func.func @transform_3(%arg0: i32) -> (i32, i32) {
    %c0_i32 = arith.constant 0 : i32
    %c0_i32_0 = arith.constant 0 : i32
    %c0_i32_1 = arith.constant 0 : i32
    return %c0_i32, %c0_i32_0 : i32, i32
  }
  func.func @transform_4(%arg0: i32) -> (i32, i32) {
    %c0_i32 = arith.constant 0 : i32
    %c0_i32_0 = arith.constant 0 : i32
    return %arg0, %c0_i32 : i32, i32
  }
}

</mosaic_0001>

<bundles_post_ra>
// kernel: tpu_custom_call.1
= control target key start
LH: loop header
LB: loop body
LE: loop exit
PB: predicated region body
PF: predicated region fallthrough
CT: control target
= control target key end

     0   :  { %9 = vsyncpa [#allocation3], 0  ;;  %s3570_s0 = inlined_call_operand.hbm [shape: f32[25,256], index: 0, kind: input, shape index: {}]   ;;  %s3571_s1 = inlined_call_operand.hbm [shape: bf16[256,512], index: 1, kind: input, shape index: {}]   ;;  %s3572_s2 = inlined_call_operand.hbm [shape: bf16[512,512], index: 2, kind: input, shape index: {}]   ;;  %s3573_s3 = inlined_call_operand.hbm [shape: bf16[512,256], index: 3, kind: input, shape index: {}]   ;;  %s3574_s4 = inlined_call_operand.hbm [shape: f32[25,256], index: 4, kind: output, shape index: {}]  }
   0x1   :  { %11 = vsyncpa [#allocation3 + $0x1], 0 }
   0x2   :  { %12 = vsyncpa [#allocation6], 0 }
   0x3   :  { %13 = vsyncpa [#allocation9], 0 }
   0x4   :  { %14 = vsyncpa [#allocation4], 0 }
   0x5   :  { %16 = vsyncpa [#allocation4 + $0x1], 0  ;;  %s3281_s15 = smov 0   ;;  %s3283_s16 = smov 0  }
   0x6   :  { %s3285_s17 = smov 0   ;;  %s3287_s18 = smov 0  }
   0x7 LB: > { %s3302_s19 = sadd.s32 4294967295, %s3243_s18   ;;  %s2294_s20 = sadd.s32 4294967294, %s3243_s18   ;;  %s3243_s18 = sphi %s3287_s18, %s3597_s18   ;;  %s3239_s17 = sphi %s3285_s17, %s3596_s17   ;;  %s3235_s16 = sphi %s3283_s16, %s3595_s16   ;;  %s3231_s15 = sphi %s3281_s15, %s3594_s15  }
   0x8   : > { %p42_p0 = scmp.ne.s32.totalorder %s3235_s16, %s3231_s15  ;;  %p3575_p1 = scmp.eq.s32.totalorder %s3302_s19, 0 }
   0x9   : > { %p135_p3 = scmp.eq.s32.totalorder %s2294_s20, 1  ;;  %p2295_p5 = scmp.ge.s32.totalorder %s3243_s18, 1 }
   0xa   : > { %p3311_p4 = por %p3575_p1, %p42_p0  ;;  %p142_p7 = scmp.lt.s32.totalorder %s3243_s18, 3 }
   0xb   : > { %p3316_p6 = por %p135_p3, %p42_p0  ;;  %s3245_s24 = smov [#allocation5]  }
   0xc   : > { %s3578_s21 = scalar_select %p3311_p4, 1, 0 }
   0xd   : > { %s3579_s22 = scalar_select %p3316_p6, 1, 0 }
   0xe   : > { %p3321_p8 = pnand %p2295_p5, %p142_p7  ;;  %s154_s25 = sshll.u32 %s3245_s24, 4  ;;  %s3325_s25 = int_to_ptr.vmem [resolvable:$true] %s154_s25 }
   0xf   : > { %s3246_s27 = smov [#allocation7]   ;;  %s3247_s29 = smov [#allocation8]  }
  0x10   : > { %s3580_s23 = scalar_select %p3321_p8, 1, 0 }
  0x11   : > { %p2604_p9 = pneg %p3321_p8  ;;  %s167_s28 = sshll.u32 %s3246_s27, 4  ;;  %s3336_s28 = int_to_ptr.vmem [resolvable:$true] %s167_s28 }
  0x12   : > { %s3338_s30 = sshll.u32 %s3247_s29, 4  ;;  %s3055_s7 = scalar_lea.hbm %s3571_s1, 8192  ;;  %s181_s30 = int_to_ptr.vmem [resolvable:$true] %s3338_s30 }
  0x13   : > { %p3332_p11 = pnand %p2604_p9, %p3575_p1  ;;  %p3056_p12 = scmp.ne.s32.totalorder %s3571_s1, %s3055_s7 }
  0x14   : > { %p3062_p5 = scmp.lt.u32.totalorder %s3055_s7, %s3571_s1 }
  0x15   : > { %p3348_p13 = pneg %p3332_p11 }
  0x17   : > { %p3058_p0 = pnand %p3348_p13, %p3056_p12 }
  0x19   : > { %p3059_p3 = pneg %p3058_p0 }
  0x1b   : > { %p3064_p7 = pnand %p3062_p5, %p3059_p3 }
  0x1d   : > { %3067 = shalt.err (!%p3064_p7)
}
  0x1e   : > { %s3068_s13 = scalar_lea.vmem %s3325_s25, 8192  ;;  %p3076_p2 = scmp.lt.s32.totalorder %s3325_s25, %s3325_s25 }
  0x1f   : > { %p3069_p9 = scmp.ne.s32.totalorder %s3325_s25, %s3068_s13  ;;  %p3077_p6 = scmp.lt.s32.totalorder %s3068_s13, %s3068_s13 }
  0x21   : > { %p3071_p10 = pnand %p3069_p9, %p3348_p13  ;;  %p3078_p12 = por %p3077_p6, %p3076_p2 }
  0x23   : > { %p3072_p1 = pneg %p3071_p10 }
  0x25   : > { %p3079_p0 = pnand %p3078_p12, %p3072_p1 }
  0x27   : > { %3082 = shalt.err (!%p3079_p0)
}
  0x28   : > { %s3248_s14 = smov 256   ;;  %s3249_s20 = smov 16  }
  0x29   : > { %2607 = dma.hbm_to_vmem [thread:$0]  (!%p3332_p11), %s3571_s1, 8192, %s3325_s25, [#allocation6], %s3248_s14, %s3248_s14, %s3249_s20  }
  0x2a   : > { %s3083_s6 = scalar_lea.hbm %s3572_s2, 16384 }
  0x2b   : > { %p3084_p1 = scmp.ne.s32.totalorder %s3572_s2, %s3083_s6  ;;  %p3090_p10 = scmp.lt.u32.totalorder %s3083_s6, %s3572_s2 }
  0x2d   : > { %p3086_p2 = pnand %p3084_p1, %p3348_p13 }
  0x2f   : > { %p3087_p6 = pneg %p3086_p2 }
  0x31   : > { %p3092_p3 = pnand %p3090_p10, %p3087_p6 }
  0x33   : > { %3095 = shalt.err (!%p3092_p3)
}
  0x34   : > { %s3096_s25 = scalar_lea.vmem %s3336_s28, 16384  ;;  %p3104_p12 = scmp.lt.s32.totalorder %s3336_s28, %s3336_s28 }
  0x35   : > { %p3097_p5 = scmp.ne.s32.totalorder %s3336_s28, %s3096_s25  ;;  %p3105_p0 = scmp.lt.s32.totalorder %s3096_s25, %s3096_s25 }
  0x37   : > { %p3099_p7 = pnand %p3097_p5, %p3348_p13  ;;  %p3106_p1 = por %p3105_p0, %p3104_p12 }
  0x39   : > { %p3100_p9 = pneg %p3099_p7 }
  0x3b   : > { %p3107_p2 = pnand %p3106_p1, %p3100_p9 }
  0x3d   : > { %3110 = shalt.err (!%p3107_p2)
}
  0x3e   : > { %2610 = dma.hbm_to_vmem [thread:$0]  (!%p3332_p11), %s3572_s2, 16384, %s3336_s28, [#allocation6], %s3248_s14, %s3248_s14, %s3249_s20  }
  0x3f   : > { %s3111_s29 = scalar_lea.hbm %s3573_s3, 8192 }
  0x40   : > { %p3112_p6 = scmp.ne.s32.totalorder %s3573_s3, %s3111_s29  ;;  %p3118_p5 = scmp.lt.u32.totalorder %s3111_s29, %s3573_s3 }
  0x42   : > { %p3114_p10 = pnand %p3112_p6, %p3348_p13 }
  0x44   : > { %p3115_p3 = pneg %p3114_p10 }
  0x46   : > { %p3120_p7 = pnand %p3118_p5, %p3115_p3 }
  0x48   : > { %3123 = shalt.err (!%p3120_p7)
}
  0x49   : > { %s3124_s9 = scalar_lea.vmem %s181_s30, 8192  ;;  %p3132_p1 = scmp.lt.s32.totalorder %s181_s30, %s181_s30 }
  0x4a   : > { %p3125_p9 = scmp.ne.s32.totalorder %s181_s30, %s3124_s9  ;;  %p3133_p2 = scmp.lt.s32.totalorder %s3124_s9, %s3124_s9 }
  0x4c   : > { %p3127_p12 = pnand %p3125_p9, %p3348_p13  ;;  %p3134_p4 = por %p3133_p2, %p3132_p1 }
  0x4e   : > { %p3128_p0 = pneg %p3127_p12 }
  0x50   : > { %p3135_p8 = pnand %p3134_p4, %p3128_p0 }
  0x52   : > { %3138 = shalt.err (!%p3135_p8)
}
  0x53   : > { %s3250_s28 = smov 128   ;;  %s3251_s10 = smov 8  }
  0x54   : > { %2613 = dma.hbm_to_vmem [thread:$0]  (!%p3332_p11), %s3573_s3, 8192, %s181_s30, [#allocation9], %s3250_s28, %s3250_s28, %s3251_s10  }
  0x55   : > { %s3418_s12 = sadd.s32 1, %s3243_s18   ;;  %s29_s24 = sadd.s32 1, %s3239_s17 }
  0x56   : > { %s26_s13 = ssub.s32 %s3243_s18, %s3418_s12  ;;  %p36_p8 = scmp.ne.s32.totalorder %s3239_s17, %s3235_s16 }
  0x57   : > { %p27_p4 = scmp.eq.s32.totalorder %s26_s13, 0  ;;  %p37_p13 = scmp.eq.s32.totalorder %s3243_s18, 0 }
  0x58   : > { %p2625_p6 = scmp.lt.s32.totalorder %s3243_s18, 2  ;;  %p3583_p3 = scmp.eq.s32.totalorder %s3302_s19, 1 }
  0x59   : > { %s3428_s27 = scalar_select %p27_p4, %s3239_s17, %s29_s24  }
  0x5a   : > { %p38_p10 = por %p37_p13, %p36_p8  ;;  %p3432_p5 = por %p3583_p3, %p36_p8 }
  0x5b   : > { %s194_s26 = sand.u32 1, %s3239_s17   ;;  %s2573_s5 = sshll.u32 %s3243_s18, 9 }
  0x5c   : > { %s2300_s30 = sshll.u32 %s194_s26, 5  ;;  %s3441_s8 = scalar_lea.hbm %s3570_s0, %s2573_s5 }
  0x5d   : > { %s198_s9 = scalar_lea.vmem [#allocation2], %s2300_s30  ;;  %p3443_p11 = pnand %p2625_p6, %p38_p10 }
  0x5e   : > { %s206_s28 = sshll.u32 %s198_s9, 4  ;;  %s3449_s11 = scalar_lea.sflag [#allocation3], %s194_s26  ;;  %s3447_s28 = int_to_ptr.vmem [resolvable:$true] %s206_s28 }
  0x5f   : > { %s3139_s25 = scalar_lea.hbm %s3441_s8, 512  ;;  %p3141_p9 = pneg %p3443_p11 }
  0x60   : > { %p3140_p7 = scmp.ne.s32.totalorder %s3441_s8, %s3139_s25  ;;  %s3144_s5 = scalar_lea.hbm %s3570_s0, 1024 }
  0x61   : > { %p3145_p1 = scmp.lt.u32.totalorder %s3441_s8, %s3570_s0  ;;  %p3146_p2 = scmp.lt.u32.totalorder %s3144_s5, %s3139_s25 }
  0x62   : > { %p3142_p12 = pnand %p3141_p9, %p3140_p7  ;;  %p3148_p8 = scmp.lt.u32.totalorder %s3139_s25, %s3441_s8 }
  0x63   : > { %p3147_p4 = por %p3146_p2, %p3145_p1 }
  0x64   : > { %p3143_p0 = pneg %p3142_p12 }
  0x65   : > { %p3149_p13 = por %p3148_p8, %p3147_p4 }
  0x67   : > { %p3150_p6 = pnand %p3149_p13, %p3143_p0 }
  0x69   : > { %3153 = shalt.err (!%p3150_p6)
}
  0x6a   : > { %s3154_s26 = scalar_lea.vmem %s3447_s28, 512  ;;  %s3252_s7 = smov [#allocation2]  }
  0x6b   : > { %p3155_p10 = scmp.ne.s32.totalorder %s3447_s28, %s3154_s26  ;;  %s3159_s9 = sshll.u32 %s3252_s7, 4  ;;  %s3160_s9 = int_to_ptr.vmem [resolvable:$false] %s3159_s9 }
  0x6c   : > { %s3161_s13 = scalar_lea.vmem %s3160_s9, 1024  ;;  %p3162_p12 = scmp.lt.s32.totalorder %s3447_s28, %s3160_s9 }
  0x6d   : > { %p3157_p3 = pnand %p3155_p10, %p3141_p9  ;;  %p3163_p1 = scmp.lt.s32.totalorder %s3161_s13, %s3154_s26 }
  0x6f   : > { %p3158_p7 = pneg %p3157_p3  ;;  %p3164_p2 = por %p3163_p1, %p3162_p12 }
  0x71   : > { %p3165_p4 = pnand %p3164_p2, %p3158_p7 }
  0x73   : > { %3168 = shalt.err (!%p3165_p4)
}
  0x74   : > { %2617 = dma.hbm_to_vmem [thread:$0]  (!%p3443_p11), %s3441_s8, 512, %s3447_s28, %s3449_s11, %s3248_s14, %s3248_s14, %s3249_s20  }
  0x75   : > { %p3586_p9 = scmp.ne.s32.totalorder %s3580_s23, 0 }
  0x76   : > { %s3483_s25 = sand.u32 (!%p3586_p9), 1, %s3235_s16   ;;  %p3587_p0 = scmp.ne.s32.totalorder (!%p3586_p9), %s3578_s21, 0 }
  0x77   : > { %218 = sbr.rel (%p3586_p9) target bundleno = 997 (0x3e5), region = 36  ;;  %s2305_s24 = sshll.u32 (!%p3586_p9), %s3483_s25, 5 }
  0x78   : > { %s221_s5 = scalar_lea.sflag (!%p3586_p9), [#allocation3], %s3483_s25  ;;  %s3489_s10 = scalar_lea.vmem (!%p3586_p9), [#allocation2], %s2305_s24 }
  0x7e   : > { %3214 = dma.done.wait (%p3587_p0), %s221_s5, 512  }
  0x7f   : > { %3216 = vsyncadd (%p3587_p0), %s221_s5, 4294966784  ;;  %p3588_p11 = scmp.eq.s32.totalorder %s3302_s19, 0 }
  0x81   : > { %3218 = dma.done.wait (%p3588_p11), [#allocation6], 24576   ;;  %p3589_p8 = pmov %p3588_p11 }
  0x83   : > { %3220 = vsyncadd (%p3589_p8), [#allocation6], 4294942720  ;;  %p3590_p13 = pmov %p3589_p8 }
  0x84   : > { %p3591_p6 = pmov %p3589_p8 }
  0x85   : > { %3222 = dma.done.wait (%p3590_p13), [#allocation9], 8192  }
  0x86   : > { %3224 = vsyncadd (%p3591_p6), [#allocation9], 4294959104  ;;  %v2671_v0 = vld [vmem:[#allocation5 + $0x4] ss:$16 sps:$4 sm:$0xff]   ;;  %v2673_v1 = vld [vmem:[#allocation5] ss:$16 sps:$4 sm:$0xff]  }
  0x87   : > { %653 = vmatprep.subr.bf16.mxu1 %v2671_v0  ;;  %v2674_v2 = vld [vmem:[#allocation5 + $0x24] ss:$16 sps:$4 sm:$0xff]   ;;  %v2676_v3 = vld [vmem:[#allocation5 + $0x20] ss:$16 sps:$4 sm:$0xff]   ;;  %v264_v13 = vld [vmem:[%s3489_s10 + $0x8] sm:$0xff]  ;;  %s260_s21 = scalar_lea.vmem [#allocation10], %s2305_s24 }
  0x88   : > { %654 = vmatpush1.bf16.msra.mxu1 %v2673_v1  ;;  %v2677_v4 = vld [vmem:[#allocation5 + $0x44] ss:$16 sps:$4 sm:$0xff]   ;;  %v2679_v5 = vld [vmem:[#allocation5 + $0x40] ss:$16 sps:$4 sm:$0xff]   ;;  %v266_v14 = vld [vmem:[%s3489_s10 + $0x18] sm:$0xff]  ;;  %s2192_s23 = sshll.u32 %s260_s21, 4  ;;  %s3521_s23 = int_to_ptr.vmem [resolvable:$true] %s2192_s23 }
  0x89   : > { %655 = vmatprep.subr.bf16.mxu1 %v2674_v2  ;;  %v2680_v6 = vld [vmem:[#allocation5 + $0x64] ss:$16 sps:$4 sm:$0xff]   ;;  %v2682_v7 = vld [vmem:[#allocation5 + $0x60] ss:$16 sps:$4 sm:$0xff]   ;;  %v3505_v15 = vpack.c.bf16 %v266_v14, %v264_v13  ;;  %v2721_v46 = vld [vmem:[#allocation5 + $0xc] ss:$16 sps:$4 sm:$0xff]  }
  0x8a   : > { %v2683_v8 = vld [vmem:[#allocation5 + $0x84] ss:$16 sps:$4 sm:$0xff]   ;;  %v2685_v9 = vld [vmem:[#allocation5 + $0x80] ss:$16 sps:$4 sm:$0xff]   ;;  %v2719_v50 = vld [vmem:[#allocation5 + $0x8] ss:$16 sps:$4 sm:$0xff]  }
  0x8b   : > { %v2686_v10 = vld [vmem:[#allocation5 + $0xa4] ss:$16 sps:$4 sm:$0xff]   ;;  %v2688_v11 = vld [vmem:[#allocation5 + $0xa0] ss:$16 sps:$4 sm:$0xff]   ;;  %685 = vmatprep.mubr.bf16.mxu1 %v3505_v15  ;;  %v2724_v51 = vld [vmem:[#allocation5 + $0x2c] ss:$16 sps:$4 sm:$0xff]  }
  0x8c   : > { %656 = vmatpush1.bf16.msra.mxu1 %v2676_v3  ;;  %v2689_v12 = vld [vmem:[#allocation5 + $0xc4] ss:$16 sps:$4 sm:$0xff]   ;;  %v2691_v16 = vld [vmem:[#allocation5 + $0xc0] ss:$16 sps:$4 sm:$0xff]   ;;  %v2722_v54 = vld [vmem:[#allocation5 + $0x28] ss:$16 sps:$4 sm:$0xff]  }
  0x8d   : > { %657 = vmatprep.subr.bf16.mxu1 %v2677_v4  ;;  %v2692_v17 = vld [vmem:[#allocation5 + $0xe4] ss:$16 sps:$4 sm:$0xff]   ;;  %v2694_v18 = vld [vmem:[#allocation5 + $0xe0] ss:$16 sps:$4 sm:$0xff]   ;;  %v2727_v55 = vld [vmem:[#allocation5 + $0x4c] ss:$16 sps:$4 sm:$0xff]  }
  0x8e   : > { %v2695_v19 = vld [vmem:[#allocation5 + $0x104] ss:$16 sps:$4 sm:$0xff]   ;;  %v2697_v20 = vld [vmem:[#allocation5 + $0x100] ss:$16 sps:$4 sm:$0xff]   ;;  %v2725_v58 = vld [vmem:[#allocation5 + $0x48] ss:$16 sps:$4 sm:$0xff]  }
  0x8f   : > { %v2698_v21 = vld [vmem:[#allocation5 + $0x124] ss:$16 sps:$4 sm:$0xff]   ;;  %v2700_v22 = vld [vmem:[#allocation5 + $0x120] ss:$16 sps:$4 sm:$0xff]   ;;  %v2730_v59 = vld [vmem:[#allocation5 + $0x6c] ss:$16 sps:$4 sm:$0xff]  }
  0x90   : > { %658 = vmatpush1.bf16.msra.mxu1 %v2679_v5  ;;  %v2701_v23 = vld [vmem:[#allocation5 + $0x144] ss:$16 sps:$4 sm:$0xff]   ;;  %v2703_v24 = vld [vmem:[#allocation5 + $0x140] ss:$16 sps:$4 sm:$0xff]   ;;  %v2728_v62 = vld [vmem:[#allocation5 + $0x68] ss:$16 sps:$4 sm:$0xff]  }
  0x91   : > { %659 = vmatprep.subr.bf16.mxu1 %v2680_v6  ;;  %v2704_v25 = vld [vmem:[#allocation5 + $0x164] ss:$16 sps:$4 sm:$0xff]   ;;  %v2706_v26 = vld [vmem:[#allocation5 + $0x160] ss:$16 sps:$4 sm:$0xff]   ;;  %v2733_v63 = vld [vmem:[#allocation5 + $0x8c] ss:$16 sps:$4 sm:$0xff]  }
  0x92   : > { %v2707_v27 = vld [vmem:[#allocation5 + $0x184] ss:$16 sps:$4 sm:$0xff]   ;;  %v2709_v29 = vld [vmem:[#allocation5 + $0x180] ss:$16 sps:$4 sm:$0xff]   ;;  %v2731_v2 = vld [vmem:[#allocation5 + $0x88] ss:$16 sps:$4 sm:$0xff]  }
  0x93   : > { %v2767_v28 = vld [vmem:[#allocation7 + $0x4] ss:$16 sps:$4 sm:$0xff]   ;;  %v2772_v30 = vld [vmem:[#allocation7] ss:$16 sps:$4 sm:$0xff]   ;;  %v2736_v3 = vld [vmem:[#allocation5 + $0xac] ss:$16 sps:$4 sm:$0xff]  }
  0x94   : > { %660 = vmatpush1.bf16.msra.mxu1 %v2682_v7  ;;  %1519 = vmatprep.subr.bf16.mxu0 %v2767_v28  ;;  %v2773_v31 = vld [vmem:[#allocation7 + $0x24] ss:$16 sps:$4 sm:$0xff]   ;;  %v2778_v33 = vld [vmem:[#allocation7 + $0x20] ss:$16 sps:$4 sm:$0xff]   ;;  %v2734_v5 = vld [vmem:[#allocation5 + $0xa8] ss:$16 sps:$4 sm:$0xff]  }
  0x95   : > { %661 = vmatprep.subr.bf16.mxu1 %v2683_v8  ;;  %v2710_v32 = vld [vmem:[#allocation5 + $0x1a4] ss:$16 sps:$4 sm:$0xff]   ;;  %1520 = vmatpush1.bf16.msra.mxu0 %v2772_v30  ;;  %v2712_v35 = vld [vmem:[#allocation5 + $0x1a0] ss:$16 sps:$4 sm:$0xff]   ;;  %v2739_v7 = vld [vmem:[#allocation5 + $0xcc] ss:$16 sps:$4 sm:$0xff]  }
  0x96   : > { %1521 = vmatprep.subr.bf16.mxu0 %v2773_v31  ;;  %v2779_v34 = vld [vmem:[#allocation7 + $0x44] ss:$16 sps:$4 sm:$0xff]   ;;  %v2784_v37 = vld [vmem:[#allocation7 + $0x40] ss:$16 sps:$4 sm:$0xff]   ;;  %v2740_v14 = vld [vmem:[#allocation5 + $0xe8] ss:$16 sps:$4 sm:$0xff]  }
  0x97   : > { %v2713_v36 = vld [vmem:[#allocation5 + $0x1c4] ss:$16 sps:$4 sm:$0xff]   ;;  %v2715_v39 = vld [vmem:[#allocation5 + $0x1c0] ss:$16 sps:$4 sm:$0xff]   ;;  %v2760_v28 = vld [vmem:[#allocation5 + $0x1ac] ss:$16 sps:$4 sm:$0xff]  }
  0x98   : > { %662 = vmatpush1.bf16.msra.mxu1 %v2685_v9  ;;  %v2785_v38 = vld [vmem:[#allocation7 + $0x64] ss:$16 sps:$4 sm:$0xff]   ;;  %v2790_v41 = vld [vmem:[#allocation7 + $0x60] ss:$16 sps:$4 sm:$0xff]   ;;  %v2763_v30 = vld [vmem:[#allocation5 + $0x1cc] ss:$16 sps:$4 sm:$0xff]  }
  0x99   : > { %663 = vmatprep.subr.bf16.mxu1 %v2686_v10  ;;  %1522 = vmatpush1.bf16.msra.mxu0 %v2778_v33  ;;  %v2716_v40 = vld [vmem:[#allocation5 + $0x1e4] ss:$16 sps:$4 sm:$0xff]   ;;  %v2718_v43 = vld [vmem:[#allocation5 + $0x1e0] ss:$16 sps:$4 sm:$0xff]   ;;  %v2737_v10 = vld [vmem:[#allocation5 + $0xc8] ss:$16 sps:$4 sm:$0xff]  }
  0x9a   : > { %1523 = vmatprep.subr.bf16.mxu0 %v2779_v34  ;;  %v2791_v42 = vld [vmem:[#allocation7 + $0x84] ss:$16 sps:$4 sm:$0xff]   ;;  %v2796_v47 = vld [vmem:[#allocation7 + $0x80] ss:$16 sps:$4 sm:$0xff]   ;;  %v2761_v31 = vld [vmem:[#allocation5 + $0x1c8] ss:$16 sps:$4 sm:$0xff]  }
  0x9b   : > { %v263_v44 = vld [vmem:[%s3489_s10] sm:$0xff]  ;;  %v265_v45 = vld [vmem:[%s3489_s10 + $0x10] sm:$0xff]  ;;  %v2764_v33 = vld [vmem:[#allocation5 + $0x1e8] ss:$16 sps:$4 sm:$0xff]   ;;  %s2575_s14 = sshll.u32 %s3302_s19, 9  ;;  %s2178_s11 = scalar_lea.sflag [#allocation4], %s3483_s25 }
  0x9c   : > { %664 = vmatpush1.bf16.msra.mxu1 %v2688_v11  ;;  %v2797_v48 = vld [vmem:[#allocation7 + $0xa4] ss:$16 sps:$4 sm:$0xff]   ;;  %v3510_v49 = vpack.c.bf16 %v265_v45, %v263_v44  ;;  %v2802_v52 = vld [vmem:[#allocation7 + $0xa0] ss:$16 sps:$4 sm:$0xff]   ;;  %v2742_v11 = vld [vmem:[#allocation5 + $0xec] ss:$16 sps:$4 sm:$0xff]   ;;  %s3526_s28 = scalar_lea.hbm %s3574_s4, %s2575_s14 }
  0x9d   : > { %665 = vmatprep.subr.bf16.mxu1 %v2689_v12  ;;  %1524 = vmatpush1.bf16.msra.mxu0 %v2784_v37  ;;  %v2803_v53 = vld [vmem:[#allocation7 + $0xc4] ss:$16 sps:$4 sm:$0xff]   ;;  %v2808_v56 = vld [vmem:[#allocation7 + $0xc0] ss:$16 sps:$4 sm:$0xff]   ;;  %v2771_v34 = vld [vmem:[#allocation7 + $0xc] ss:$16 sps:$4 sm:$0xff]  }
  0x9e   : > { %1525 = vmatprep.subr.bf16.mxu0 %v2785_v38  ;;  %v2809_v57 = vld [vmem:[#allocation7 + $0xe4] ss:$16 sps:$4 sm:$0xff]   ;;  %v2814_v60 = vld [vmem:[#allocation7 + $0xe0] ss:$16 sps:$4 sm:$0xff]   ;;  %v2775_v37 = vld [vmem:[#allocation7 + $0x28] ss:$16 sps:$4 sm:$0xff]  }
  0x9f   : > { %v2815_v61 = vld [vmem:[#allocation7 + $0x104] ss:$16 sps:$4 sm:$0xff]   ;;  %v2820_v0 = vld [vmem:[#allocation7 + $0x100] ss:$16 sps:$4 sm:$0xff]   ;;  %v2783_v38 = vld [vmem:[#allocation7 + $0x4c] ss:$16 sps:$4 sm:$0xff]  }
  0xa0   : > { %666 = vmatpush1.bf16.msra.mxu1 %v2691_v16  ;;  %v2821_v1 = vld [vmem:[#allocation7 + $0x124] ss:$16 sps:$4 sm:$0xff]   ;;  %v2826_v4 = vld [vmem:[#allocation7 + $0x120] ss:$16 sps:$4 sm:$0xff]   ;;  %v2801_v44 = vld [vmem:[#allocation7 + $0xac] ss:$16 sps:$4 sm:$0xff]  }
  0xa1   : > { %667 = vmatprep.subr.bf16.mxu1 %v2692_v17  ;;  %1526 = vmatpush1.bf16.msra.mxu0 %v2790_v41  ;;  %v2827_v6 = vld [vmem:[#allocation7 + $0x144] ss:$16 sps:$4 sm:$0xff]   ;;  %v2832_v8 = vld [vmem:[#allocation7 + $0x140] ss:$16 sps:$4 sm:$0xff]   ;;  %v2787_v41 = vld [vmem:[#allocation7 + $0x68] ss:$16 sps:$4 sm:$0xff]  }
  0xa2   : > { %1527 = vmatprep.subr.bf16.mxu0 %v2791_v42  ;;  %v2833_v9 = vld [vmem:[#allocation7 + $0x164] ss:$16 sps:$4 sm:$0xff]   ;;  %v2838_v12 = vld [vmem:[#allocation7 + $0x160] ss:$16 sps:$4 sm:$0xff]   ;;  %v2795_v42 = vld [vmem:[#allocation7 + $0x8c] ss:$16 sps:$4 sm:$0xff]  }
  0xa3   : > { %v2839_v13 = vld [vmem:[#allocation7 + $0x184] ss:$16 sps:$4 sm:$0xff]   ;;  %v2844_v16 = vld [vmem:[#allocation7 + $0x180] ss:$16 sps:$4 sm:$0xff]   ;;  %v2799_v45 = vld [vmem:[#allocation7 + $0xa8] ss:$16 sps:$4 sm:$0xff]  }
  0xa4   : > { %668 = vmatpush1.bf16.msra.mxu1 %v2694_v18  ;;  %v2845_v17 = vld [vmem:[#allocation7 + $0x1a4] ss:$16 sps:$4 sm:$0xff]   ;;  %v2743_v18 = vld [vmem:[#allocation5 + $0x108] ss:$16 sps:$4 sm:$0xff]   ;;  %s3169_s19 = scalar_lea.vmem %s3521_s23, 512  ;;  %s3253_s30 = smov [#allocation10]  }
  0xa5   : > { %669 = vmatprep.subr.bf16.mxu1 %v2695_v19  ;;  %1528 = vmatpush1.bf16.msra.mxu0 %v2796_v47  ;;  %v2748_v19 = vld [vmem:[#allocation5 + $0x12c] ss:$16 sps:$4 sm:$0xff]   ;;  %v2851_v47 = vld [vmem:[#allocation7 + $0x1c4] ss:$16 sps:$4 sm:$0xff]   ;;  %p3170_p10 = scmp.ne.s32.totalorder %s3521_s23, %s3169_s19  ;;  %s3173_s6 = sshll.u32 %s3253_s30, 4  ;;  %s3174_s6 = int_to_ptr.vmem [resolvable:$false] %s3173_s6 }
  0xa6   : > { %1529 = vmatprep.subr.bf16.mxu0 %v2797_v48  ;;  %v2856_v48 = vld [vmem:[#allocation7 + $0x1c0] ss:$16 sps:$4 sm:$0xff]   ;;  %s3175_s26 = scalar_lea.vmem %s3174_s6, 1024  ;;  %p3176_p12 = scmp.lt.s32.totalorder %s3521_s23, %s3174_s6 }
  0xa7   : > { %p3171_p3 = pnand %p3170_p10, %p3432_p5  ;;  %p3177_p1 = scmp.lt.s32.totalorder %s3175_s26, %s3169_s19 }
  0xa8   : > { %670 = vmatpush1.bf16.msra.mxu1 %v2697_v20  ;;  %v2850_v20 = vld [vmem:[#allocation7 + $0x1a0] ss:$16 sps:$4 sm:$0xff]  }
  0xa9   : > { %671 = vmatprep.subr.bf16.mxu1 %v2698_v21  ;;  %1530 = vmatpush1.bf16.msra.mxu0 %v2802_v52  ;;  %v2746_v21 = vld [vmem:[#allocation5 + $0x128] ss:$16 sps:$4 sm:$0xff]   ;;  %v2862_v52 = vld [vmem:[#allocation7 + $0x1e0] ss:$16 sps:$4 sm:$0xff]   ;;  %p3172_p7 = pneg %p3171_p3  ;;  %p3178_p2 = por %p3177_p1, %p3176_p12 }
  0xaa   : > { %1531 = vmatprep.subr.bf16.mxu0 %v2803_v53  ;;  %v2811_v53 = vld [vmem:[#allocation7 + $0xe8] ss:$16 sps:$4 sm:$0xff]  }
  0xab   : > { %p3179_p4 = pnand %p3178_p2, %p3172_p7 }
  0xac   : > { %672 = vmatpush1.bf16.msra.mxu1 %v2700_v22  ;;  %v2751_v22 = vld [vmem:[#allocation5 + $0x14c] ss:$16 sps:$4 sm:$0xff]  }
  0xad   : > { %673 = vmatprep.subr.bf16.mxu1 %v2701_v23  ;;  %1532 = vmatpush1.bf16.msra.mxu0 %v2808_v56  ;;  %v2749_v23 = vld [vmem:[#allocation5 + $0x148] ss:$16 sps:$4 sm:$0xff]  }
  0xae   : > { %1533 = vmatprep.subr.bf16.mxu0 %v2809_v57  ;;  %v2817_v56 = vld [vmem:[#allocation7 + $0x108] ss:$16 sps:$4 sm:$0xff]   ;;  %v2825_v57 = vld [vmem:[#allocation7 + $0x12c] ss:$16 sps:$4 sm:$0xff]  }
  0xb0   : > { %674 = vmatpush1.bf16.msra.mxu1 %v2703_v24  ;;  %v2754_v24 = vld [vmem:[#allocation5 + $0x16c] ss:$16 sps:$4 sm:$0xff]  }
  0xb1   : > { %675 = vmatprep.subr.bf16.mxu1 %v2704_v25  ;;  %1534 = vmatpush1.bf16.msra.mxu0 %v2814_v60  ;;  %v2752_v25 = vld [vmem:[#allocation5 + $0x168] ss:$16 sps:$4 sm:$0xff]  }
  0xb2   : > { %1535 = vmatprep.subr.bf16.mxu0 %v2815_v61  ;;  %v2829_v60 = vld [vmem:[#allocation7 + $0x148] ss:$16 sps:$4 sm:$0xff]   ;;  %v2837_v61 = vld [vmem:[#allocation7 + $0x16c] ss:$16 sps:$4 sm:$0xff]  }
  0xb4   : > { %676 = vmatpush1.bf16.msra.mxu1 %v2706_v26  ;;  %v2757_v26 = vld [vmem:[#allocation5 + $0x18c] ss:$16 sps:$4 sm:$0xff]  }
  0xb5   : > { %677 = vmatprep.subr.bf16.mxu1 %v2707_v27  ;;  %1536 = vmatpush1.bf16.msra.mxu0 %v2820_v0  ;;  %v2755_v27 = vld [vmem:[#allocation5 + $0x188] ss:$16 sps:$4 sm:$0xff]  }
  0xb6   : > { %1537 = vmatprep.subr.bf16.mxu0 %v2821_v1  ;;  %v2841_v0 = vld [vmem:[#allocation7 + $0x188] ss:$16 sps:$4 sm:$0xff]   ;;  %v2849_v1 = vld [vmem:[#allocation7 + $0x1ac] ss:$16 sps:$4 sm:$0xff]  }
  0xb8   : > { %678 = vmatpush1.bf16.msra.mxu1 %v2709_v29  ;;  %v2758_v29 = vld [vmem:[#allocation5 + $0x1a8] ss:$16 sps:$4 sm:$0xff]  }
  0xb9   : > { %679 = vmatprep.subr.bf16.mxu1 %v2710_v32  ;;  %1538 = vmatpush1.bf16.msra.mxu0 %v2826_v4  ;;  %v2766_v32 = vld [vmem:[#allocation5 + $0x1ec] ss:$16 sps:$4 sm:$0xff]   ;;  %v2853_v4 = vld [vmem:[#allocation7 + $0x1c8] ss:$16 sps:$4 sm:$0xff]  }
  0xba   : > { %1539 = vmatprep.subr.bf16.mxu0 %v2827_v6  ;;  %v2859_v6 = vld [vmem:[#allocation7 + $0x1e8] ss:$16 sps:$4 sm:$0xff]  }
  0xbc   : > { %680 = vmatpush1.bf16.msra.mxu1 %v2712_v35  ;;  %v2769_v35 = vld [vmem:[#allocation7 + $0x8] ss:$16 sps:$4 sm:$0xff]  }
  0xbd   : > { %681 = vmatprep.subr.bf16.mxu1 %v2713_v36  ;;  %1540 = vmatpush1.bf16.msra.mxu0 %v2832_v8  ;;  %v2777_v36 = vld [vmem:[#allocation7 + $0x2c] ss:$16 sps:$4 sm:$0xff]  }
  0xbe   : > { %1541 = vmatprep.subr.bf16.mxu0 %v2833_v9 }
  0xc0   : > { %682 = vmatpush1.bf16.msra.mxu1 %v2715_v39  ;;  %v2781_v39 = vld [vmem:[#allocation7 + $0x48] ss:$16 sps:$4 sm:$0xff]  }
  0xc1   : > { %683 = vmatprep.subr.bf16.mxu1 %v2716_v40  ;;  %1542 = vmatpush1.bf16.msra.mxu0 %v2838_v12  ;;  %v2789_v40 = vld [vmem:[#allocation7 + $0x6c] ss:$16 sps:$4 sm:$0xff]  }
  0xc2   : > { %1543 = vmatprep.subr.bf16.mxu0 %v2839_v13 }
  0xc4   : > { %684 = vmatpush1.bf16.msra.mxu1 %v2718_v43  ;;  %v2793_v43 = vld [vmem:[#allocation7 + $0x88] ss:$16 sps:$4 sm:$0xff]  }
  0xc5   : > { %696 = vmatprep.subr.bf16.mxu1 %v2721_v46  ;;  %1544 = vmatpush1.bf16.msra.mxu0 %v2844_v16  ;;  %v2807_v46 = vld [vmem:[#allocation7 + $0xcc] ss:$16 sps:$4 sm:$0xff]  }
  0xc6   : > { %1545 = vmatprep.subr.bf16.mxu0 %v2845_v17 }
  0xc7   : > { %686 = vmatmul.mubr.bf16.vlgmr.msra.gmra.mrb[0].mxu1 %v3510_v49 }
  0xc8   : > { %697 = vmatpush1.bf16.msra.mxu1 %v2719_v50  ;;  %728 = vmatprep.mubr.bf16.mxu1 %v3505_v15  ;;  %v2745_v15 = vld [vmem:[#allocation5 + $0x10c] ss:$16 sps:$4 sm:$0xff]  }
  0xc9   : > { %698 = vmatprep.subr.bf16.mxu1 %v2724_v51  ;;  %1546 = vmatpush1.bf16.msra.mxu0 %v2850_v20  ;;  %v2813_v50 = vld [vmem:[#allocation7 + $0xec] ss:$16 sps:$4 sm:$0xff]   ;;  %v2857_v51 = vld [vmem:[#allocation7 + $0x1e4] ss:$16 sps:$4 sm:$0xff]  }
  0xca   : > { %1547 = vmatprep.subr.bf16.mxu0 %v2851_v47  ;;  %v2871_v20 = vld [vmem:[#allocation7 + $0x224] ss:$16 sps:$4 sm:$0xff]   ;;  %v2908_v47 = vld [vmem:[#allocation7 + $0x2e8] ss:$16 sps:$4 sm:$0xff]  }
  0xcc   : > { %699 = vmatpush1.bf16.msra.mxu1 %v2722_v54  ;;  %v2819_v54 = vld [vmem:[#allocation7 + $0x10c] ss:$16 sps:$4 sm:$0xff]  }
  0xcd   : > { %700 = vmatprep.subr.bf16.mxu1 %v2727_v55  ;;  %1548 = vmatpush1.bf16.msra.mxu0 %v2856_v48  ;;  %v2865_v55 = vld [vmem:[#allocation7 + $0x204] ss:$16 sps:$4 sm:$0xff]  }
  0xce   : > { %1549 = vmatprep.subr.bf16.mxu0 %v2857_v51  ;;  %v2913_v48 = vld [vmem:[#allocation7 + $0x304] ss:$16 sps:$4 sm:$0xff]   ;;  %v2914_v51 = vld [vmem:[#allocation7 + $0x308] ss:$16 sps:$4 sm:$0xff]  }
  0xd0   : > { %701 = vmatpush1.bf16.msra.mxu1 %v2725_v58  ;;  %v2823_v58 = vld [vmem:[#allocation7 + $0x128] ss:$16 sps:$4 sm:$0xff]  }
  0xd1   : > { %702 = vmatprep.subr.bf16.mxu1 %v2730_v59  ;;  %1550 = vmatpush1.bf16.msra.mxu0 %v2862_v52  ;;  %v2831_v59 = vld [vmem:[#allocation7 + $0x14c] ss:$16 sps:$4 sm:$0xff]   ;;  %v2919_v52 = vld [vmem:[#allocation7 + $0x324] ss:$16 sps:$4 sm:$0xff]  }
  0xd2   : > { %1562 = vmatprep.subr.bf16.mxu0 %v2865_v55  ;;  %v2920_v55 = vld [vmem:[#allocation7 + $0x328] ss:$16 sps:$4 sm:$0xff]  }
  0xd4   : > { %703 = vmatpush1.bf16.msra.mxu1 %v2728_v62  ;;  %v2835_v62 = vld [vmem:[#allocation7 + $0x168] ss:$16 sps:$4 sm:$0xff]  }
  0xd5   : > { %704 = vmatprep.subr.bf16.mxu1 %v2733_v63  ;;  %v2843_v63 = vld [vmem:[#allocation7 + $0x18c] ss:$16 sps:$4 sm:$0xff]  }
  0xd8   : > { %705 = vmatpush1.bf16.msra.mxu1 %v2731_v2  ;;  %v2847_v2 = vld [vmem:[#allocation7 + $0x1a8] ss:$16 sps:$4 sm:$0xff]  }
  0xd9   : > { %706 = vmatprep.subr.bf16.mxu1 %v2736_v3  ;;  %v2855_v3 = vld [vmem:[#allocation7 + $0x1cc] ss:$16 sps:$4 sm:$0xff]  }
  0xdc   : > { %707 = vmatpush1.bf16.msra.mxu1 %v2734_v5  ;;  %v2861_v5 = vld [vmem:[#allocation7 + $0x1ec] ss:$16 sps:$4 sm:$0xff]  }
  0xdd   : > { %708 = vmatprep.subr.bf16.mxu1 %v2739_v7  ;;  %v2868_v7 = vld [vmem:[#allocation7 + $0x20c] ss:$16 sps:$4 sm:$0xff]  }
  0xe0   : > { %709 = vmatpush1.bf16.msra.mxu1 %v2737_v10 }
  0xe1   : > { %710 = vmatprep.subr.bf16.mxu1 %v2742_v11 }
  0xe4   : > { %711 = vmatpush1.bf16.msra.mxu1 %v2740_v14 }
  0xe5   : > { %712 = vmatprep.subr.bf16.mxu1 %v2745_v15 }
  0xe8   : > { %713 = vmatpush1.bf16.msra.mxu1 %v2743_v18  ;;  %v2863_v18 = vld [vmem:[#allocation7 + $0x200] ss:$16 sps:$4 sm:$0xff]  }
  0xe9   : > { %714 = vmatprep.subr.bf16.mxu1 %v2748_v19  ;;  %v2866_v19 = vld [vmem:[#allocation7 + $0x208] ss:$16 sps:$4 sm:$0xff]  }
  0xec   : > { %715 = vmatpush1.bf16.msra.mxu1 %v2746_v21  ;;  %v2874_v21 = vld [vmem:[#allocation7 + $0x22c] ss:$16 sps:$4 sm:$0xff]  }
  0xed   : > { %716 = vmatprep.subr.bf16.mxu1 %v2751_v22  ;;  %v2869_v22 = vld [vmem:[#allocation7 + $0x220] ss:$16 sps:$4 sm:$0xff]  }
  0xf0   : > { %717 = vmatpush1.bf16.msra.mxu1 %v2749_v23  ;;  %v2872_v23 = vld [vmem:[#allocation7 + $0x228] ss:$16 sps:$4 sm:$0xff]  }
  0xf1   : > { %718 = vmatprep.subr.bf16.mxu1 %v2754_v24  ;;  %v2877_v24 = vld [vmem:[#allocation7 + $0x244] ss:$16 sps:$4 sm:$0xff]  }
  0xf4   : > { %719 = vmatpush1.bf16.msra.mxu1 %v2752_v25  ;;  %v2880_v25 = vld [vmem:[#allocation7 + $0x24c] ss:$16 sps:$4 sm:$0xff]  }
  0xf5   : > { %720 = vmatprep.subr.bf16.mxu1 %v2757_v26  ;;  %v2875_v26 = vld [vmem:[#allocation7 + $0x240] ss:$16 sps:$4 sm:$0xff]  }
  0xf8   : > { %721 = vmatpush1.bf16.msra.mxu1 %v2755_v27  ;;  %v2878_v27 = vld [vmem:[#allocation7 + $0x248] ss:$16 sps:$4 sm:$0xff]  }
  0xf9   : > { %722 = vmatprep.subr.bf16.mxu1 %v2760_v28  ;;  %v2883_v28 = vld [vmem:[#allocation7 + $0x264] ss:$16 sps:$4 sm:$0xff]  }
  0xfc   : > { %723 = vmatpush1.bf16.msra.mxu1 %v2758_v29  ;;  %v2886_v29 = vld [vmem:[#allocation7 + $0x26c] ss:$16 sps:$4 sm:$0xff]  }
  0xfd   : > { %724 = vmatprep.subr.bf16.mxu1 %v2763_v30  ;;  %v2881_v30 = vld [vmem:[#allocation7 + $0x260] ss:$16 sps:$4 sm:$0xff]  }
 0x100   : > { %725 = vmatpush1.bf16.msra.mxu1 %v2761_v31  ;;  %v2884_v31 = vld [vmem:[#allocation7 + $0x268] ss:$16 sps:$4 sm:$0xff]  }
 0x101   : > { %726 = vmatprep.subr.bf16.mxu1 %v2766_v32  ;;  %v2889_v32 = vld [vmem:[#allocation7 + $0x284] ss:$16 sps:$4 sm:$0xff]  }
 0x104   : > { %727 = vmatpush1.bf16.msra.mxu1 %v2764_v33  ;;  %v2892_v33 = vld [vmem:[#allocation7 + $0x28c] ss:$16 sps:$4 sm:$0xff]  }
 0x105   : > { %1605 = vmatprep.subr.bf16.mxu1 %v2771_v34  ;;  %v2887_v34 = vld [vmem:[#allocation7 + $0x280] ss:$16 sps:$4 sm:$0xff]  }
 0x107   : > { %729 = vmatmul.mubr.bf16.vlgmr.msra.gmra.mrb[4].mxu1 %v3510_v49  ;;  %v2805_v49 = vld [vmem:[#allocation7 + $0xc8] ss:$16 sps:$4 sm:$0xff]  }
 0x108   : > { %1606 = vmatpush1.bf16.msra.mxu1 %v2769_v35  ;;  %v2890_v35 = vld [vmem:[#allocation7 + $0x288] ss:$16 sps:$4 sm:$0xff]  }
 0x109   : > { %1607 = vmatprep.subr.bf16.mxu1 %v2777_v36  ;;  %v2895_v36 = vld [vmem:[#allocation7 + $0x2a4] ss:$16 sps:$4 sm:$0xff]  }
 0x10c   : > { %1608 = vmatpush1.bf16.msra.mxu1 %v2775_v37  ;;  %v2898_v37 = vld [vmem:[#allocation7 + $0x2ac] ss:$16 sps:$4 sm:$0xff]  }
 0x10d   : > { %1609 = vmatprep.subr.bf16.mxu1 %v2783_v38  ;;  %v2893_v38 = vld [vmem:[#allocation7 + $0x2a0] ss:$16 sps:$4 sm:$0xff]  }
 0x110   : > { %1610 = vmatpush1.bf16.msra.mxu1 %v2781_v39  ;;  %v2896_v39 = vld [vmem:[#allocation7 + $0x2a8] ss:$16 sps:$4 sm:$0xff]  }
 0x111   : > { %1611 = vmatprep.subr.bf16.mxu1 %v2789_v40  ;;  %v2901_v40 = vld [vmem:[#allocation7 + $0x2c4] ss:$16 sps:$4 sm:$0xff]  }
 0x114   : > { %1612 = vmatpush1.bf16.msra.mxu1 %v2787_v41  ;;  %v2904_v41 = vld [vmem:[#allocation7 + $0x2cc] ss:$16 sps:$4 sm:$0xff]  }
 0x115   : > { %1613 = vmatprep.subr.bf16.mxu1 %v2795_v42  ;;  %v2899_v42 = vld [vmem:[#allocation7 + $0x2c0] ss:$16 sps:$4 sm:$0xff]  }
 0x118   : > { %1614 = vmatpush1.bf16.msra.mxu1 %v2793_v43  ;;  %v2902_v43 = vld [vmem:[#allocation7 + $0x2c8] ss:$16 sps:$4 sm:$0xff]  }
 0x119   : > { %1615 = vmatprep.subr.bf16.mxu1 %v2801_v44  ;;  %v2907_v44 = vld [vmem:[#allocation7 + $0x2e4] ss:$16 sps:$4 sm:$0xff]  }
 0x11c   : > { %1616 = vmatpush1.bf16.msra.mxu1 %v2799_v45  ;;  %v2910_v45 = vld [vmem:[#allocation7 + $0x2ec] ss:$16 sps:$4 sm:$0xff]  }
 0x11d   : > { %1617 = vmatprep.subr.bf16.mxu1 %v2807_v46  ;;  %v2905_v46 = vld [vmem:[#allocation7 + $0x2e0] ss:$16 sps:$4 sm:$0xff]  }
 0x120   : > { %1618 = vmatpush1.bf16.msra.mxu1 %v2805_v49  ;;  %v2916_v49 = vld [vmem:[#allocation7 + $0x30c] ss:$16 sps:$4 sm:$0xff]  }
 0x121   : > { %1619 = vmatprep.subr.bf16.mxu1 %v2813_v50  ;;  %v2911_v50 = vld [vmem:[#allocation7 + $0x300] ss:$16 sps:$4 sm:$0xff]  }
 0x124   : > { %1620 = vmatpush1.bf16.msra.mxu1 %v2811_v53  ;;  %v2922_v53 = vld [vmem:[#allocation7 + $0x32c] ss:$16 sps:$4 sm:$0xff]  }
 0x125   : > { %1621 = vmatprep.subr.bf16.mxu1 %v2819_v54  ;;  %v2917_v54 = vld [vmem:[#allocation7 + $0x320] ss:$16 sps:$4 sm:$0xff]  }
 0x128   : > { %1622 = vmatpush1.bf16.msra.mxu1 %v2817_v56  ;;  %v2925_v56 = vld [vmem:[#allocation7 + $0x344] ss:$16 sps:$4 sm:$0xff]  }
 0x129   : > { %1623 = vmatprep.subr.bf16.mxu1 %v2825_v57  ;;  %v2928_v57 = vld [vmem:[#allocation7 + $0x34c] ss:$16 sps:$4 sm:$0xff]  }
 0x12c   : > { %1624 = vmatpush1.bf16.msra.mxu1 %v2823_v58  ;;  %v2923_v58 = vld [vmem:[#allocation7 + $0x340] ss:$16 sps:$4 sm:$0xff]  }
 0x12d   : > { %1625 = vmatprep.subr.bf16.mxu1 %v2831_v59  ;;  %v2926_v59 = vld [vmem:[#allocation7 + $0x348] ss:$16 sps:$4 sm:$0xff]  }
 0x130   : > { %1626 = vmatpush1.bf16.msra.mxu1 %v2829_v60  ;;  %v2931_v60 = vld [vmem:[#allocation7 + $0x364] ss:$16 sps:$4 sm:$0xff]  }
 0x131   : > { %1627 = vmatprep.subr.bf16.mxu1 %v2837_v61  ;;  %v2934_v61 = vld [vmem:[#allocation7 + $0x36c] ss:$16 sps:$4 sm:$0xff]  }
 0x134   : > { %1628 = vmatpush1.bf16.msra.mxu1 %v2835_v62  ;;  %v2929_v62 = vld [vmem:[#allocation7 + $0x360] ss:$16 sps:$4 sm:$0xff]  }
 0x135   : > { %1629 = vmatprep.subr.bf16.mxu1 %v2843_v63  ;;  %v2932_v63 = vld [vmem:[#allocation7 + $0x368] ss:$16 sps:$4 sm:$0xff]  }
 0x138   : > { %1630 = vmatpush1.bf16.msra.mxu1 %v2841_v0  ;;  %v2937_v0 = vld [vmem:[#allocation7 + $0x384] ss:$16 sps:$4 sm:$0xff]  }
 0x139   : > { %1631 = vmatprep.subr.bf16.mxu1 %v2849_v1  ;;  %v2940_v1 = vld [vmem:[#allocation7 + $0x38c] ss:$16 sps:$4 sm:$0xff]  }
 0x13c   : > { %1632 = vmatpush1.bf16.msra.mxu1 %v2847_v2  ;;  %v2935_v2 = vld [vmem:[#allocation7 + $0x380] ss:$16 sps:$4 sm:$0xff]  }
 0x13d   : > { %1633 = vmatprep.subr.bf16.mxu1 %v2855_v3  ;;  %v2938_v3 = vld [vmem:[#allocation7 + $0x388] ss:$16 sps:$4 sm:$0xff]  }
 0x140   : > { %1634 = vmatpush1.bf16.msra.mxu1 %v2853_v4  ;;  %v2943_v4 = vld [vmem:[#allocation7 + $0x3a4] ss:$16 sps:$4 sm:$0xff]  }
 0x141   : > { %1635 = vmatprep.subr.bf16.mxu1 %v2861_v5  ;;  %v2946_v5 = vld [vmem:[#allocation7 + $0x3ac] ss:$16 sps:$4 sm:$0xff]  }
 0x144   : > { %1636 = vmatpush1.bf16.msra.mxu1 %v2859_v6  ;;  %v2941_v6 = vld [vmem:[#allocation7 + $0x3a0] ss:$16 sps:$4 sm:$0xff]  }
 0x145   : > { %1648 = vmatprep.subr.bf16.mxu1 %v2868_v7  ;;  %v2944_v7 = vld [vmem:[#allocation7 + $0x3a8] ss:$16 sps:$4 sm:$0xff]  }
 0x19a   : > { %v687_v8 = vpop.f32.mrb[0].mxu1 }
 0x19b   : > { %v739_v9 = vmax.f32 %v687_v8, 0.0  ;;  %v689_v10 = vpop.f32.mrb[1].mxu1  ;;  %v2949_v8 = vld [vmem:[#allocation7 + $0x3c4] ss:$16 sps:$4 sm:$0xff]  }
 0x19c   : > { %v691_v11 = vpop.f32.mrb[2].mxu1  ;;  %v740_v14 = vmax.f32 %v689_v10, 0.0  ;;  %v2947_v10 = vld [vmem:[#allocation7 + $0x3c0] ss:$16 sps:$4 sm:$0xff]  }
 0x19d   : > { %v743_v12 = vmax.f32 %v691_v11, 0.0  ;;  %v693_v13 = vpop.f32.mrb[3].mxu1  ;;  %v2950_v11 = vld [vmem:[#allocation7 + $0x3c8] ss:$16 sps:$4 sm:$0xff]  }
 0x19e   : > { %v744_v15 = vmax.f32 %v693_v13, 0.0  ;;  %v2958_v13 = vld [vmem:[#allocation7 + $0x3ec] ss:$16 sps:$4 sm:$0xff]  }
 0x19f   : > { %v747_v16 = vpack.c.bf16 %v743_v12, %v739_v9  ;;  %v2952_v9 = vld [vmem:[#allocation7 + $0x3cc] ss:$16 sps:$4 sm:$0xff]   ;;  %v2955_v12 = vld [vmem:[#allocation7 + $0x3e4] ss:$16 sps:$4 sm:$0xff]  }
 0x1a0   : > { %v748_v17 = vpack.c.bf16 %v744_v15, %v740_v14 }
 0x1a2   : > { %1551 = vmatprep.mubr.bf16.mxu0 %v748_v17  ;;  %1637 = vmatprep.mubr.bf16.mxu1 %v748_v17  ;;  %v2953_v17 = vld [vmem:[#allocation7 + $0x3e0] ss:$16 sps:$4 sm:$0xff]  }
 0x1a3   : > { %1552 = vmatmul.mubr.bf16.vlgmr.msra.gmra.mrb[0].mxu0 %v747_v16  ;;  %1638 = vmatmul.mubr.bf16.vlgmr.msra.gmra.mrb[8].mxu1 %v747_v16 }
 0x1a4   : > { %1563 = vmatpush1.bf16.msra.mxu0 %v2863_v18  ;;  %1649 = vmatpush1.bf16.msra.mxu1 %v2866_v19  ;;  %v2956_v18 = vld [vmem:[#allocation7 + $0x3e8] ss:$16 sps:$4 sm:$0xff]  }
 0x1a5   : > { %1564 = vmatprep.subr.bf16.mxu0 %v2871_v20  ;;  %1650 = vmatprep.subr.bf16.mxu1 %v2874_v21 }
 0x1a8   : > { %1565 = vmatpush1.bf16.msra.mxu0 %v2869_v22  ;;  %1651 = vmatpush1.bf16.msra.mxu1 %v2872_v23  ;;  %v2961_v22 = vld [vmem:[#allocation8 + $0x4] ss:$8 sps:$4 sm:$0xff]  }
 0x1a9   : > { %1566 = vmatprep.subr.bf16.mxu0 %v2877_v24  ;;  %1652 = vmatprep.subr.bf16.mxu1 %v2880_v25 }
 0x1ac   : > { %1567 = vmatpush1.bf16.msra.mxu0 %v2875_v26  ;;  %1653 = vmatpush1.bf16.msra.mxu1 %v2878_v27  ;;  %v2959_v27 = vld [vmem:[#allocation8] ss:$8 sps:$4 sm:$0xff]  }
 0x1ad   : > { %1568 = vmatprep.subr.bf16.mxu0 %v2883_v28  ;;  %1654 = vmatprep.subr.bf16.mxu1 %v2886_v29  ;;  %v2964_v28 = vld [vmem:[#allocation8 + $0x14] ss:$8 sps:$4 sm:$0xff]   ;;  %v2962_v29 = vld [vmem:[#allocation8 + $0x10] ss:$8 sps:$4 sm:$0xff]  }
 0x1b0   : > { %1569 = vmatpush1.bf16.msra.mxu0 %v2881_v30  ;;  %1655 = vmatpush1.bf16.msra.mxu1 %v2884_v31  ;;  %v2967_v30 = vld [vmem:[#allocation8 + $0x24] ss:$8 sps:$4 sm:$0xff]   ;;  %v2965_v31 = vld [vmem:[#allocation8 + $0x20] ss:$8 sps:$4 sm:$0xff]  }
 0x1b1   : > { %1570 = vmatprep.subr.bf16.mxu0 %v2889_v32  ;;  %1656 = vmatprep.subr.bf16.mxu1 %v2892_v33  ;;  %v2970_v32 = vld [vmem:[#allocation8 + $0x34] ss:$8 sps:$4 sm:$0xff]   ;;  %v2968_v33 = vld [vmem:[#allocation8 + $0x30] ss:$8 sps:$4 sm:$0xff]  }
 0x1b4   : > { %1571 = vmatpush1.bf16.msra.mxu0 %v2887_v34  ;;  %1657 = vmatpush1.bf16.msra.mxu1 %v2890_v35  ;;  %v2973_v34 = vld [vmem:[#allocation8 + $0x44] ss:$8 sps:$4 sm:$0xff]   ;;  %v2971_v35 = vld [vmem:[#allocation8 + $0x40] ss:$8 sps:$4 sm:$0xff]  }
 0x1b5   : > { %1572 = vmatprep.subr.bf16.mxu0 %v2895_v36  ;;  %1658 = vmatprep.subr.bf16.mxu1 %v2898_v37  ;;  %v2976_v36 = vld [vmem:[#allocation8 + $0x54] ss:$8 sps:$4 sm:$0xff]   ;;  %v2974_v37 = vld [vmem:[#allocation8 + $0x50] ss:$8 sps:$4 sm:$0xff]  }
 0x1b8   : > { %1573 = vmatpush1.bf16.msra.mxu0 %v2893_v38  ;;  %1659 = vmatpush1.bf16.msra.mxu1 %v2896_v39  ;;  %v2979_v38 = vld [vmem:[#allocation8 + $0x64] ss:$8 sps:$4 sm:$0xff]   ;;  %v2977_v39 = vld [vmem:[#allocation8 + $0x60] ss:$8 sps:$4 sm:$0xff]  }
 0x1b9   : > { %1574 = vmatprep.subr.bf16.mxu0 %v2901_v40  ;;  %1660 = vmatprep.subr.bf16.mxu1 %v2904_v41  ;;  %v2982_v40 = vld [vmem:[#allocation8 + $0x74] ss:$8 sps:$4 sm:$0xff]   ;;  %v2980_v41 = vld [vmem:[#allocation8 + $0x70] ss:$8 sps:$4 sm:$0xff]  }
 0x1bc   : > { %1575 = vmatpush1.bf16.msra.mxu0 %v2899_v42  ;;  %1661 = vmatpush1.bf16.msra.mxu1 %v2902_v43  ;;  %v2985_v42 = vld [vmem:[#allocation8 + $0x84] ss:$8 sps:$4 sm:$0xff]   ;;  %v2983_v43 = vld [vmem:[#allocation8 + $0x80] ss:$8 sps:$4 sm:$0xff]  }
 0x1bd   : > { %1576 = vmatprep.subr.bf16.mxu0 %v2907_v44  ;;  %1662 = vmatprep.subr.bf16.mxu1 %v2910_v45  ;;  %v2988_v44 = vld [vmem:[#allocation8 + $0x94] ss:$8 sps:$4 sm:$0xff]   ;;  %v2986_v45 = vld [vmem:[#allocation8 + $0x90] ss:$8 sps:$4 sm:$0xff]  }
 0x1c0   : > { %1577 = vmatpush1.bf16.msra.mxu0 %v2905_v46  ;;  %1663 = vmatpush1.bf16.msra.mxu1 %v2908_v47  ;;  %v2991_v46 = vld [vmem:[#allocation8 + $0xa4] ss:$8 sps:$4 sm:$0xff]   ;;  %v2989_v47 = vld [vmem:[#allocation8 + $0xa0] ss:$8 sps:$4 sm:$0xff]  }
 0x1c1   : > { %1578 = vmatprep.subr.bf16.mxu0 %v2913_v48  ;;  %1664 = vmatprep.subr.bf16.mxu1 %v2916_v49  ;;  %v2994_v48 = vld [vmem:[#allocation8 + $0xb4] ss:$8 sps:$4 sm:$0xff]   ;;  %v2992_v49 = vld [vmem:[#allocation8 + $0xb0] ss:$8 sps:$4 sm:$0xff]  }
 0x1c4   : > { %1579 = vmatpush1.bf16.msra.mxu0 %v2911_v50  ;;  %1665 = vmatpush1.bf16.msra.mxu1 %v2914_v51  ;;  %v2997_v50 = vld [vmem:[#allocation8 + $0xc4] ss:$8 sps:$4 sm:$0xff]   ;;  %v2995_v51 = vld [vmem:[#allocation8 + $0xc0] ss:$8 sps:$4 sm:$0xff]  }
 0x1c5   : > { %1580 = vmatprep.subr.bf16.mxu0 %v2919_v52  ;;  %1666 = vmatprep.subr.bf16.mxu1 %v2922_v53  ;;  %v3000_v52 = vld [vmem:[#allocation8 + $0xd4] ss:$8 sps:$4 sm:$0xff]   ;;  %v2998_v53 = vld [vmem:[#allocation8 + $0xd0] ss:$8 sps:$4 sm:$0xff]  }
 0x1c8   : > { %1581 = vmatpush1.bf16.msra.mxu0 %v2917_v54  ;;  %1667 = vmatpush1.bf16.msra.mxu1 %v2920_v55  ;;  %v3003_v54 = vld [vmem:[#allocation8 + $0xe4] ss:$8 sps:$4 sm:$0xff]   ;;  %v3001_v55 = vld [vmem:[#allocation8 + $0xe0] ss:$8 sps:$4 sm:$0xff]  }
 0x1c9   : > { %1582 = vmatprep.subr.bf16.mxu0 %v2925_v56  ;;  %1668 = vmatprep.subr.bf16.mxu1 %v2928_v57  ;;  %v3006_v56 = vld [vmem:[#allocation8 + $0xf4] ss:$8 sps:$4 sm:$0xff]   ;;  %v3004_v57 = vld [vmem:[#allocation8 + $0xf0] ss:$8 sps:$4 sm:$0xff]  }
 0x1cc   : > { %1583 = vmatpush1.bf16.msra.mxu0 %v2923_v58  ;;  %1669 = vmatpush1.bf16.msra.mxu1 %v2926_v59  ;;  %v3009_v58 = vld [vmem:[#allocation8 + $0x104] ss:$8 sps:$4 sm:$0xff]  }
 0x1cd   : > { %1584 = vmatprep.subr.bf16.mxu0 %v2931_v60  ;;  %1670 = vmatprep.subr.bf16.mxu1 %v2934_v61 }
 0x1d0   : > { %1585 = vmatpush1.bf16.msra.mxu0 %v2929_v62  ;;  %1671 = vmatpush1.bf16.msra.mxu1 %v2932_v63 }
 0x1d1   : > { %1586 = vmatprep.subr.bf16.mxu0 %v2937_v0  ;;  %1672 = vmatprep.subr.bf16.mxu1 %v2940_v1 }
 0x1d4   : > { %1587 = vmatpush1.bf16.msra.mxu0 %v2935_v2  ;;  %1673 = vmatpush1.bf16.msra.mxu1 %v2938_v3 }
 0x1d5   : > { %1588 = vmatprep.subr.bf16.mxu0 %v2943_v4  ;;  %1674 = vmatprep.subr.bf16.mxu1 %v2946_v5 }
 0x1d8   : > { %1589 = vmatpush1.bf16.msra.mxu0 %v2941_v6  ;;  %1675 = vmatpush1.bf16.msra.mxu1 %v2944_v7 }
 0x1d9   : > { %1590 = vmatprep.subr.bf16.mxu0 %v2949_v8  ;;  %1676 = vmatprep.subr.bf16.mxu1 %v2952_v9 }
 0x1da   : > { %v730_v14 = vpop.f32.mrb[4].mxu1 }
 0x1db   : > { %v732_v15 = vpop.f32.mrb[5].mxu1  ;;  %v741_v19 = vmax.f32 %v730_v14, 0.0 }
 0x1dc   : > { %v734_v16 = vpop.f32.mrb[6].mxu1  ;;  %1591 = vmatpush1.bf16.msra.mxu0 %v2947_v10  ;;  %1677 = vmatpush1.bf16.msra.mxu1 %v2950_v11  ;;  %v742_v23 = vmax.f32 %v732_v15, 0.0  ;;  %v3007_v15 = vld [vmem:[#allocation8 + $0x100] ss:$8 sps:$4 sm:$0xff]  }
 0x1dd   : > { %v745_v20 = vmax.f32 %v734_v16, 0.0  ;;  %v736_v21 = vpop.f32.mrb[7].mxu1  ;;  %1592 = vmatprep.subr.bf16.mxu0 %v2955_v12  ;;  %1678 = vmatprep.subr.bf16.mxu1 %v2958_v13  ;;  %v3012_v16 = vld [vmem:[#allocation8 + $0x114] ss:$8 sps:$4 sm:$0xff]  }
 0x1de   : > { %v746_v24 = vmax.f32 %v736_v21, 0.0  ;;  %v3016_v21 = vld [vmem:[#allocation8 + $0x130] ss:$8 sps:$4 sm:$0xff]  }
 0x1df   : > { %v749_v25 = vpack.c.bf16 %v745_v20, %v741_v19  ;;  %v3013_v19 = vld [vmem:[#allocation8 + $0x120] ss:$8 sps:$4 sm:$0xff]   ;;  %v3018_v20 = vld [vmem:[#allocation8 + $0x134] ss:$8 sps:$4 sm:$0xff]  }
 0x1e0   : > { %v750_v26 = vpack.c.bf16 %v746_v24, %v742_v23  ;;  %1593 = vmatpush1.bf16.msra.mxu0 %v2953_v17  ;;  %1679 = vmatpush1.bf16.msra.mxu1 %v2956_v18  ;;  %v3010_v17 = vld [vmem:[#allocation8 + $0x110] ss:$8 sps:$4 sm:$0xff]   ;;  %v3015_v18 = vld [vmem:[#allocation8 + $0x124] ss:$8 sps:$4 sm:$0xff]   ;;  %v3019_v23 = vld [vmem:[#allocation8 + $0x140] ss:$8 sps:$4 sm:$0xff]  }
 0x1e1   : > { %2087 = vmatprep.subr.bf16.mxu0 %v2961_v22  ;;  %v3021_v22 = vld [vmem:[#allocation8 + $0x144] ss:$8 sps:$4 sm:$0xff]   ;;  %v3024_v24 = vld [vmem:[#allocation8 + $0x154] ss:$8 sps:$4 sm:$0xff]  }
 0x1e2   : > { %1594 = vmatprep.mubr.bf16.mxu0 %v750_v26  ;;  %1680 = vmatprep.mubr.bf16.mxu1 %v750_v26  ;;  %v3027_v26 = vld [vmem:[#allocation8 + $0x164] ss:$8 sps:$4 sm:$0xff]  }
 0x1e3   : > { %1595 = vmatmul.mubr.bf16.vlgmr.msra.gmra.mrb[0].mxu0 %v749_v25  ;;  %1681 = vmatmul.mubr.bf16.vlgmr.msra.gmra.mrb[8].mxu1 %v749_v25  ;;  %v3022_v25 = vld [vmem:[#allocation8 + $0x150] ss:$8 sps:$4 sm:$0xff]  }
 0x1e4   : > { %2088 = vmatpush1.bf16.msra.mxu0 %v2959_v27  ;;  %v3025_v27 = vld [vmem:[#allocation8 + $0x160] ss:$8 sps:$4 sm:$0xff]  }
 0x1e5   : > { %2089 = vmatprep.subr.bf16.mxu0 %v2964_v28  ;;  %v3030_v28 = vld [vmem:[#allocation8 + $0x174] ss:$8 sps:$4 sm:$0xff]  }
 0x1e8   : > { %2090 = vmatpush1.bf16.msra.mxu0 %v2962_v29  ;;  %v3028_v29 = vld [vmem:[#allocation8 + $0x170] ss:$8 sps:$4 sm:$0xff]  }
 0x1e9   : > { %2091 = vmatprep.subr.bf16.mxu0 %v2967_v30  ;;  %v3033_v30 = vld [vmem:[#allocation8 + $0x184] ss:$8 sps:$4 sm:$0xff]  }
 0x1ec   : > { %2092 = vmatpush1.bf16.msra.mxu0 %v2965_v31  ;;  %v3031_v31 = vld [vmem:[#allocation8 + $0x180] ss:$8 sps:$4 sm:$0xff]  }
 0x1ed   : > { %2093 = vmatprep.subr.bf16.mxu0 %v2970_v32  ;;  %v3036_v32 = vld [vmem:[#allocation8 + $0x194] ss:$8 sps:$4 sm:$0xff]  }
 0x1f0   : > { %2094 = vmatpush1.bf16.msra.mxu0 %v2968_v33  ;;  %v3034_v33 = vld [vmem:[#allocation8 + $0x190] ss:$8 sps:$4 sm:$0xff]  }
 0x1f1   : > { %2095 = vmatprep.subr.bf16.mxu0 %v2973_v34  ;;  %v3039_v34 = vld [vmem:[#allocation8 + $0x1a4] ss:$8 sps:$4 sm:$0xff]  }
 0x1f4   : > { %2096 = vmatpush1.bf16.msra.mxu0 %v2971_v35  ;;  %v3037_v35 = vld [vmem:[#allocation8 + $0x1a0] ss:$8 sps:$4 sm:$0xff]  }
 0x1f5   : > { %2097 = vmatprep.subr.bf16.mxu0 %v2976_v36  ;;  %v3042_v36 = vld [vmem:[#allocation8 + $0x1b4] ss:$8 sps:$4 sm:$0xff]  }
 0x1f8   : > { %2098 = vmatpush1.bf16.msra.mxu0 %v2974_v37  ;;  %v3040_v37 = vld [vmem:[#allocation8 + $0x1b0] ss:$8 sps:$4 sm:$0xff]  }
 0x1f9   : > { %2099 = vmatprep.subr.bf16.mxu0 %v2979_v38  ;;  %v3045_v38 = vld [vmem:[#allocation8 + $0x1c4] ss:$8 sps:$4 sm:$0xff]  }
 0x1fc   : > { %2100 = vmatpush1.bf16.msra.mxu0 %v2977_v39  ;;  %v3043_v39 = vld [vmem:[#allocation8 + $0x1c0] ss:$8 sps:$4 sm:$0xff]  }
 0x1fd   : > { %2101 = vmatprep.subr.bf16.mxu0 %v2982_v40  ;;  %v3048_v40 = vld [vmem:[#allocation8 + $0x1d4] ss:$8 sps:$4 sm:$0xff]  }
 0x200   : > { %2102 = vmatpush1.bf16.msra.mxu0 %v2980_v41  ;;  %v3046_v41 = vld [vmem:[#allocation8 + $0x1d0] ss:$8 sps:$4 sm:$0xff]  }
 0x201   : > { %2103 = vmatprep.subr.bf16.mxu0 %v2985_v42  ;;  %v3051_v42 = vld [vmem:[#allocation8 + $0x1e4] ss:$8 sps:$4 sm:$0xff]  }
 0x204   : > { %2104 = vmatpush1.bf16.msra.mxu0 %v2983_v43  ;;  %v3049_v43 = vld [vmem:[#allocation8 + $0x1e0] ss:$8 sps:$4 sm:$0xff]  }
 0x205   : > { %2105 = vmatprep.subr.bf16.mxu0 %v2988_v44  ;;  %v3054_v44 = vld [vmem:[#allocation8 + $0x1f4] ss:$8 sps:$4 sm:$0xff]  }
 0x208   : > { %2106 = vmatpush1.bf16.msra.mxu0 %v2986_v45  ;;  %v3052_v45 = vld [vmem:[#allocation8 + $0x1f0] ss:$8 sps:$4 sm:$0xff]  }
 0x209   : > { %2107 = vmatprep.subr.bf16.mxu0 %v2991_v46 }
 0x20c   : > { %2108 = vmatpush1.bf16.msra.mxu0 %v2989_v47 }
 0x20d   : > { %2109 = vmatprep.subr.bf16.mxu0 %v2994_v48 }
 0x210   : > { %2110 = vmatpush1.bf16.msra.mxu0 %v2992_v49 }
 0x211   : > { %2111 = vmatprep.subr.bf16.mxu0 %v2997_v50 }
 0x214   : > { %2112 = vmatpush1.bf16.msra.mxu0 %v2995_v51 }
 0x215   : > { %2113 = vmatprep.subr.bf16.mxu0 %v3000_v52 }
 0x218   : > { %2114 = vmatpush1.bf16.msra.mxu0 %v2998_v53 }
 0x219   : > { %2115 = vmatprep.subr.bf16.mxu0 %v3003_v54 }
 0x21c   : > { %2116 = vmatpush1.bf16.msra.mxu0 %v3001_v55 }
 0x21d   : > { %2117 = vmatprep.subr.bf16.mxu0 %v3006_v56 }
 0x220   : > { %2118 = vmatpush1.bf16.msra.mxu0 %v3004_v57 }
 0x221   : > { %2130 = vmatprep.subr.bf16.mxu0 %v3009_v58 }
 0x2b6   : > { %v1596_v59 = vpop.f32.mrb[0].mxu0  ;;  %v1682_v60 = vpop.f32.mrb[8].mxu1 }
 0x2b7   : > { %v1598_v61 = vpop.f32.mrb[1].mxu0  ;;  %v1684_v62 = vpop.f32.mrb[9].mxu1  ;;  %v1691_v1 = vmax.f32 %v1596_v59, 0.0  ;;  %v1693_v2 = vmax.f32 %v1682_v60, 0.0 }
 0x2b8   : > { %v1600_v63 = vpop.f32.mrb[2].mxu0  ;;  %v1686_v0 = vpop.f32.mrb[10].mxu1  ;;  %v1692_v7 = vmax.f32 %v1598_v61, 0.0  ;;  %v1694_v8 = vmax.f32 %v1684_v62, 0.0 }
 0x2b9   : > { %v1695_v3 = vmax.f32 %v1600_v63, 0.0  ;;  %v1697_v4 = vmax.f32 %v1686_v0, 0.0  ;;  %v1602_v5 = vpop.f32.mrb[3].mxu0  ;;  %v1688_v6 = vpop.f32.mrb[11].mxu1 }
 0x2ba   : > { %v1696_v9 = vmax.f32 %v1602_v5, 0.0  ;;  %v1698_v10 = vmax.f32 %v1688_v6, 0.0 }
 0x2bb   : > { %v1699_v11 = vpack.c.bf16 %v1695_v3, %v1691_v1  ;;  %v3515_v12 = vpack.c.bf16 %v1697_v4, %v1693_v2 }
 0x2bc   : > { %v1700_v13 = vpack.c.bf16 %v1696_v9, %v1692_v7  ;;  %v1702_v14 = vpack.c.bf16 %v1698_v10, %v1694_v8 }
 0x2be   : > { %2119 = vmatprep.mubr.bf16.mxu0 %v1700_v13 }
 0x2bf   : > { %2120 = vmatmul.mubr.bf16.vlgmr.msra.gmra.mrb[4].mxu0 %v1699_v11 }
 0x2c0   : > { %2131 = vmatpush1.bf16.msra.mxu0 %v3007_v15  ;;  %2162 = vmatprep.mubr.bf16.mxu0 %v1702_v14 }
 0x2c1   : > { %2132 = vmatprep.subr.bf16.mxu0 %v3012_v16 }
 0x2c4   : > { %2133 = vmatpush1.bf16.msra.mxu0 %v3010_v17 }
 0x2c5   : > { %2134 = vmatprep.subr.bf16.mxu0 %v3015_v18 }
 0x2c8   : > { %2135 = vmatpush1.bf16.msra.mxu0 %v3013_v19 }
 0x2c9   : > { %2136 = vmatprep.subr.bf16.mxu0 %v3018_v20 }
 0x2cc   : > { %2137 = vmatpush1.bf16.msra.mxu0 %v3016_v21 }
 0x2cd   : > { %2138 = vmatprep.subr.bf16.mxu0 %v3021_v22 }
 0x2d0   : > { %2139 = vmatpush1.bf16.msra.mxu0 %v3019_v23 }
 0x2d1   : > { %2140 = vmatprep.subr.bf16.mxu0 %v3024_v24 }
 0x2d4   : > { %2141 = vmatpush1.bf16.msra.mxu0 %v3022_v25 }
 0x2d5   : > { %2142 = vmatprep.subr.bf16.mxu0 %v3027_v26 }
 0x2d8   : > { %2143 = vmatpush1.bf16.msra.mxu0 %v3025_v27 }
 0x2d9   : > { %2144 = vmatprep.subr.bf16.mxu0 %v3030_v28 }
 0x2dc   : > { %2145 = vmatpush1.bf16.msra.mxu0 %v3028_v29 }
 0x2dd   : > { %2146 = vmatprep.subr.bf16.mxu0 %v3033_v30 }
 0x2e0   : > { %2147 = vmatpush1.bf16.msra.mxu0 %v3031_v31 }
 0x2e1   : > { %2148 = vmatprep.subr.bf16.mxu0 %v3036_v32 }
 0x2e4   : > { %2149 = vmatpush1.bf16.msra.mxu0 %v3034_v33 }
 0x2e5   : > { %2150 = vmatprep.subr.bf16.mxu0 %v3039_v34 }
 0x2e8   : > { %2151 = vmatpush1.bf16.msra.mxu0 %v3037_v35 }
 0x2e9   : > { %2152 = vmatprep.subr.bf16.mxu0 %v3042_v36 }
 0x2ec   : > { %2153 = vmatpush1.bf16.msra.mxu0 %v3040_v37 }
 0x2ed   : > { %2154 = vmatprep.subr.bf16.mxu0 %v3045_v38 }
 0x2f0   : > { %2155 = vmatpush1.bf16.msra.mxu0 %v3043_v39 }
 0x2f1   : > { %2156 = vmatprep.subr.bf16.mxu0 %v3048_v40 }
 0x2f4   : > { %2157 = vmatpush1.bf16.msra.mxu0 %v3046_v41 }
 0x2f5   : > { %2158 = vmatprep.subr.bf16.mxu0 %v3051_v42 }
 0x2f8   : > { %2159 = vmatpush1.bf16.msra.mxu0 %v3049_v43 }
 0x2f9   : > { %2160 = vmatprep.subr.bf16.mxu0 %v3054_v44 }
 0x2fc   : > { %2161 = vmatpush1.bf16.msra.mxu0 %v3052_v45 }
 0x2ff   : > { %2163 = vmatmul.mubr.bf16.vlgmr.msra.gmra.mrb[4].mxu0 %v3515_v12 }
 0x3d2   : > { %v2164_v46 = vpop.f32.mrb[4].mxu0 }
 0x3d3   : > { %2173 = vst [vmem:[%s260_s21] sm:$0xff] %v2164_v46  ;;  %v2166_v47 = vpop.f32.mrb[5].mxu0 }
 0x3d4   : > { %2174 = vst [vmem:[%s260_s21 + $0x8] sm:$0xff] %v2166_v47  ;;  %v2168_v48 = vpop.f32.mrb[6].mxu0 }
 0x3d5   : > { %2175 = vst [vmem:[%s260_s21 + $0x10] sm:$0xff] %v2168_v48  ;;  %v2170_v49 = vpop.f32.mrb[7].mxu0 }
 0x3d6   : > { %2176 = vst [vmem:[%s260_s21 + $0x18] sm:$0xff] %v2170_v49 }
 0x3d7   : > { %3182 = shalt.err (!%p3179_p4)
}
 0x3d8   : > { %s3183_s7 = scalar_lea.hbm %s3526_s28, 512  ;;  %s3187_s24 = scalar_lea.hbm %s3574_s4, 1024 }
 0x3d9   : > { %p3184_p9 = scmp.ne.s32.totalorder %s3526_s28, %s3183_s7  ;;  %p3188_p8 = scmp.lt.u32.totalorder %s3526_s28, %s3574_s4 }
 0x3da   : > { %p3189_p13 = scmp.lt.u32.totalorder %s3187_s24, %s3183_s7  ;;  %p3191_p10 = scmp.lt.u32.totalorder %s3183_s7, %s3526_s28 }
 0x3db   : > { %p3185_p0 = pnand %p3184_p9, %p3432_p5 }
 0x3dc   : > { %p3190_p6 = por %p3189_p13, %p3188_p8 }
 0x3dd   : > { %p3186_p11 = pneg %p3185_p0 }
 0x3de   : > { %p3192_p3 = por %p3191_p10, %p3190_p6 }
 0x3e0   : > { %p3193_p7 = pnand %p3192_p3, %p3186_p11 }
 0x3e2   : > { %3196 = shalt.err (!%p3193_p7)
}
 0x3e3   : > { %s3254_s21 = smov 256   ;;  %s3255_s14 = smov 16  }
 0x3e4   : > { %2602 = dma.vmem_to_hbm [thread:$0]  (%p3432_p5), %s3521_s23, 512, %s3526_s28, %s2178_s11, %s3254_s21, %s3254_s21, %s3255_s14  }
 0x3e5 PF: > { %s2207_s20 = sand.u32 1, %s3231_s15   ;;  %p3592_p12 = scmp.ne.s32.totalorder %s3579_s22, 0 }
 0x3e6   : > { %p3593_p1 = scmp.ge.s32.totalorder %s3243_s18, 2  ;;  %s2208_s8 = scalar_lea.sflag [#allocation4], %s2207_s20 }
 0x3e8   : > { %p2619_p2 = pnand %p3593_p1, %p3592_p12 }
 0x3ea   : > { %3226 = dma.done.wait (!%p2619_p2), %s2208_s8, 512  }
 0x3eb   : > { %3228 = vsyncadd (!%p2619_p2), %s2208_s8, 4294966784  ;;  %p19_p4 = scmp.ge.s32.totalorder %s3418_s12, 4   ;;  %s3594_s15 = smov %s3235_s16 }
 0x3ec   : > { %s3595_s16 = smov %s3239_s17  ;;  %s3596_s17 = smov %s3428_s27 }
 0x3ed   : > { %s3597_s18 = smov %s3418_s12  ;;  %21 = sbr.rel (!%p19_p4) target bundleno = 7 (0x7), region = 93 }
 0x3f4   :  { %2213 = vsyncpa [#allocation3], 1 }
 0x3f5   :  { %2215 = vsyncpa [#allocation3 + $0x1], 1 }
 0x3f6   :  { %2216 = vsyncpa [#allocation6], 1 }
 0x3f7   :  { %2217 = vsyncpa [#allocation9], 1 }
 0x3f8   :  { %2218 = vsyncpa [#allocation4], 1 }
 0x3f9   :  { %2220 = vsyncpa [#allocation4 + $0x1], 1 }

</bundles_post_ra>
